<compile_context>
chip_gen: v5e
topology: v5e:2x2
jax: 0.10.0
libtpu: 0.0.40
codegen_flags: <defaults>
</compile_context>

<pallas_src>
import functools
import math

import jax
import jax.numpy as jnp
from jax.experimental import pallas as pl
from jax.experimental.pallas import tpu as pltpu


def _gelu_exact(x):
    # PyTorch nn.GELU() default = exact (erf-based) GELU.
    return 0.5 * x * (1.0 + jax.lax.erf(x * (1.0 / math.sqrt(2.0))))


def residual_block_kernel(x_ref, w1_ref, w2_ref, mask_ref, o_ref, *, H, W):
    # x_ref / o_ref: (C, N*HW) slabs, HW*N on the 128-lane axis (512 lanes here)
    # w*_ref: (C, 9*C) bf16 (im2col-flattened, tap-major / Cin-minor rows)
    # mask_ref: (9*C, N*HW) f32 0/1 tap-validity mask ('same' zero padding)
    C, NHW = x_ref.shape
    w1 = w1_ref[...]
    w2 = w2_ref[...]
    mask = mask_ref[...]
    x = x_ref[...].astype(jnp.float32)             # keep f32 copy for residual

    def im2col(a):
        # 8 whole-batch lane rolls; wrap-around across image/batch boundaries
        # only lands on positions the validity mask zeroes, so rolling over the
        # fused N*HW lane axis is exact.  ONE fused mask-multiply + bf16 cast
        # over the whole (9C, N*HW) slab feeds the MXU.
        taps = []
        for kh in range(3):
            for kw in range(3):
                off = (kh - 1) * W + (kw - 1)      # flattened-HW shift of tap
                taps.append(a if off == 0 else
                            pltpu.roll(a, shift=(-off) % NHW, axis=1))
        p = jnp.concatenate(taps, axis=0)          # (9C, N*HW), sublane-aligned
        return (p * mask).astype(jnp.bfloat16)     # single mask pass + MXU cast

    # conv1 over the entire batch in one matmul.
    y = jnp.dot(w1, im2col(x), preferred_element_type=jnp.float32)
    y = _gelu_exact(y)
    # conv2 over the entire batch in one matmul.
    y = jnp.dot(w2, im2col(y), preferred_element_type=jnp.float32)
    o_ref[...] = (y + x).astype(o_ref.dtype)       # residual; 512-lane dense store


def _tap_mask(C, H, W, N):
    """(9C, N*HW) 0/1 f32 validity mask, tap-major rows matching im2col order."""
    HW = H * W
    hw = jnp.arange(HW)
    h, w = hw // W, hw % W
    rows = []
    for kh in range(3):
        for kw in range(3):
            dh, dw = kh - 1, kw - 1
            valid = (h + dh >= 0) & (h + dh < H) & (w + dw >= 0) & (w + dw < W)
            rows.append(jnp.broadcast_to(valid[None, :], (C, HW)))
    m = jnp.concatenate(rows, axis=0).astype(jnp.float32)   # (9C, HW)
    return jnp.tile(m, (1, N))                               # (9C, N*HW)


def residual_block(x_nchw, w1_oihw, w2_oihw):
    """Pallas ResidualBlock.forward; inputs follow PyTorch NCHW / OIHW layout."""
    N, C, H, W = x_nchw.shape
    HW = H * W
    NHW = N * HW

    # Whole-batch lane-dense slab: (N,C,H,W) -> (C, N*HW).  The transpose is
    # wrapper-side layout plumbing (~16 KiB) that lets the kernel issue ONE
    # im2col and ONE matmul per conv for the entire batch.
    x_slab = jnp.transpose(x_nchw.reshape(N, C, HW), (1, 0, 2)).reshape(C, NHW)

    # OIHW -> (Cout, kh, kw, Cin) -> (Cout, 9*Cin), matching im2col row order;
    # cast to bf16 once here (not per kernel step) for the MXU.
    w1f = jnp.transpose(w1_oihw, (0, 2, 3, 1)).reshape(C, 9 * C).astype(jnp.bfloat16)
    w2f = jnp.transpose(w2_oihw, (0, 2, 3, 1)).reshape(C, 9 * C).astype(jnp.bfloat16)

    mask = _tap_mask(C, H, W, N)                    # constant, built once

    kernel = functools.partial(residual_block_kernel, H=H, W=W)

    out_slab = pl.pallas_call(
        kernel,
        out_shape=jax.ShapeDtypeStruct((C, NHW), x_nchw.dtype),
        grid_spec=pltpu.PrefetchScalarGridSpec(
            num_scalar_prefetch=0,
            grid=(1,),
            in_specs=[
                pl.BlockSpec((C, NHW), lambda i: (0, 0)),
                pl.BlockSpec((C, 9 * C), lambda i: (0, 0)),
                pl.BlockSpec((C, 9 * C), lambda i: (0, 0)),
                pl.BlockSpec((9 * C, NHW), lambda i: (0, 0)),
            ],
            out_specs=pl.BlockSpec((C, NHW), lambda i: (0, 0)),
        ),
        compiler_params=pltpu.CompilerParams(
            dimension_semantics=("arbitrary",),
            vmem_limit_bytes=32 * 1024 * 1024,
        ),
    )(x_slab, w1f, w2f, mask)

    return jnp.transpose(out_slab.reshape(C, N, HW), (1, 0, 2)).reshape(N, C, H, W)


def _reference(x, w1, w2):
    """Pure-JAX f32 reference matching the PyTorch module (NCHW / OIHW)."""
    dn = ("NCHW", "OIHW", "NCHW")
    y = jax.lax.conv_general_dilated(x, w1, (1, 1), ((1, 1), (1, 1)),
                                     dimension_numbers=dn)
    y = _gelu_exact(y)
    y = jax.lax.conv_general_dilated(y, w2, (1, 1), ((1, 1), (1, 1)),
                                     dimension_numbers=dn)
    return y + x


if __name__ == "__main__":
    N, C, H, W = 2, 8, 16, 16          # small shapes: batch=2, dim=8, spatial=16

    key = jax.random.PRNGKey(0)
    kx, k1, k2 = jax.random.split(key, 3)

    x = jax.random.normal(kx, (N, C, H, W), jnp.float32)
    # Deterministic kaiming-style init for the two bias-free 3x3 convs (OIHW).
    fan_in = C * 3 * 3
    w1 = jax.random.normal(k1, (C, C, 3, 3), jnp.float32) / math.sqrt(fan_in)
    w2 = jax.random.normal(k2, (C, C, 3, 3), jnp.float32) / math.sqrt(fan_in)

    out = jax.block_until_ready(residual_block(x, w1, w2))
    ref = _reference(x, w1, w2)

    assert out.shape == ref.shape and out.dtype == ref.dtype
    # MXU is fed bf16 operands (f32 accumulate), hence a slightly looser
    # tolerance than exact-f32 parity; still catches any layout/indexing bug.
    assert jnp.allclose(out, ref, rtol=2e-2, atol=2e-2), (
        float(jnp.max(jnp.abs(out - ref))))

    print("KERNEL_OK")
</pallas_src>

<mosaic_0001>
module attributes {stable_mosaic.version = 11 : i64} {
  func.func @residual_block_kernel(%arg0: i32, %arg1: memref<8x512xf32, #tpu.memory_space<vmem>>, %arg2: memref<8x72xbf16, #tpu.memory_space<vmem>>, %arg3: memref<8x72xbf16, #tpu.memory_space<vmem>>, %arg4: memref<72x512xf32, #tpu.memory_space<vmem>>, %arg5: memref<8x512xf32, #tpu.memory_space<vmem>>) attributes {dimension_semantics = [#tpu.dimension_semantics<arbitrary>], iteration_bounds = array<i64: 1>, scalar_prefetch = 0 : i64, scratch_operands = 0 : i64, tpu.core_type = #tpu.core_type<tc>, window_params = [{pipeline_mode = #tpu.pipeline_mode<synchronous>, transform_indices = @transform_0, window_bounds = array<i64: 8, 512>}, {pipeline_mode = #tpu.pipeline_mode<synchronous>, transform_indices = @transform_1, window_bounds = array<i64: 8, 72>}, {pipeline_mode = #tpu.pipeline_mode<synchronous>, transform_indices = @transform_2, window_bounds = array<i64: 8, 72>}, {pipeline_mode = #tpu.pipeline_mode<synchronous>, transform_indices = @transform_3, window_bounds = array<i64: 72, 512>}, {pipeline_mode = #tpu.pipeline_mode<synchronous>, transform_indices = @transform_4, window_bounds = array<i64: 8, 512>}]} {
    %c0 = arith.constant 0 : index
    %c0_0 = arith.constant 0 : index
    %0 = vector.load %arg2[%c0, %c0_0] : memref<8x72xbf16, #tpu.memory_space<vmem>>, vector<8x72xbf16>
    %c0_1 = arith.constant 0 : index
    %c0_2 = arith.constant 0 : index
    %1 = vector.load %arg3[%c0_1, %c0_2] : memref<8x72xbf16, #tpu.memory_space<vmem>>, vector<8x72xbf16>
    %c0_3 = arith.constant 0 : index
    %c0_4 = arith.constant 0 : index
    %2 = vector.load %arg4[%c0_3, %c0_4] : memref<72x512xf32, #tpu.memory_space<vmem>>, vector<72x512xf32>
    %c0_5 = arith.constant 0 : index
    %c0_6 = arith.constant 0 : index
    %3 = vector.load %arg1[%c0_5, %c0_6] : memref<8x512xf32, #tpu.memory_space<vmem>>, vector<8x512xf32>
    %c17_i32 = arith.constant 17 : i32
    %4 = tpu.dynamic_rotate %3 by %c17_i32 dim 1 : vector<8x512xf32>, i32 -> vector<8x512xf32>
    %c16_i32 = arith.constant 16 : i32
    %5 = tpu.dynamic_rotate %3 by %c16_i32 dim 1 : vector<8x512xf32>, i32 -> vector<8x512xf32>
    %c15_i32 = arith.constant 15 : i32
    %6 = tpu.dynamic_rotate %3 by %c15_i32 dim 1 : vector<8x512xf32>, i32 -> vector<8x512xf32>
    %c1_i32 = arith.constant 1 : i32
    %7 = tpu.dynamic_rotate %3 by %c1_i32 dim 1 : vector<8x512xf32>, i32 -> vector<8x512xf32>
    %c511_i32 = arith.constant 511 : i32
    %8 = tpu.dynamic_rotate %3 by %c511_i32 dim 1 : vector<8x512xf32>, i32 -> vector<8x512xf32>
    %c497_i32 = arith.constant 497 : i32
    %9 = tpu.dynamic_rotate %3 by %c497_i32 dim 1 : vector<8x512xf32>, i32 -> vector<8x512xf32>
    %c496_i32 = arith.constant 496 : i32
    %10 = tpu.dynamic_rotate %3 by %c496_i32 dim 1 : vector<8x512xf32>, i32 -> vector<8x512xf32>
    %c495_i32 = arith.constant 495 : i32
    %11 = tpu.dynamic_rotate %3 by %c495_i32 dim 1 : vector<8x512xf32>, i32 -> vector<8x512xf32>
    %12 = tpu.concatenate %4, %5, %6, %7, %3, %8, %9, %10, %11 in 0 : vector<8x512xf32>, vector<8x512xf32>, vector<8x512xf32>, vector<8x512xf32>, vector<8x512xf32>, vector<8x512xf32>, vector<8x512xf32>, vector<8x512xf32>, vector<8x512xf32> -> vector<72x512xf32>
    %13 = arith.mulf %12, %2 : vector<72x512xf32>
    %14 = arith.truncf %13 : vector<72x512xf32> to vector<72x512xbf16>
    %cst = arith.constant dense<0.000000e+00> : vector<8x512xf32>
    %15 = tpu.matmul %0, %14, %cst {dimension_numbers = #tpu.dot_dimension_numbers<[1], [0], [0], [1], [0, 0, 1, 1], [], []>} : vector<8x72xbf16>, vector<72x512xbf16>, vector<8x512xf32> -> vector<8x512xf32>
    %cst_7 = arith.constant 5.000000e-01 : f32
    %16 = vector.broadcast %cst_7 : f32 to vector<8x512xf32>
    %17 = arith.mulf %16, %15 : vector<8x512xf32>
    %cst_8 = arith.constant 0.707106769 : f32
    %18 = vector.broadcast %cst_8 : f32 to vector<8x512xf32>
    %19 = arith.mulf %15, %18 : vector<8x512xf32>
    %20 = math.erf %19 : vector<8x512xf32>
    %cst_9 = arith.constant 1.000000e+00 : f32
    %21 = vector.broadcast %cst_9 : f32 to vector<8x512xf32>
    %22 = arith.addf %21, %20 : vector<8x512xf32>
    %23 = arith.mulf %17, %22 : vector<8x512xf32>
    %c17_i32_10 = arith.constant 17 : i32
    %24 = tpu.dynamic_rotate %23 by %c17_i32_10 dim 1 : vector<8x512xf32>, i32 -> vector<8x512xf32>
    %c16_i32_11 = arith.constant 16 : i32
    %25 = tpu.dynamic_rotate %23 by %c16_i32_11 dim 1 : vector<8x512xf32>, i32 -> vector<8x512xf32>
    %c15_i32_12 = arith.constant 15 : i32
    %26 = tpu.dynamic_rotate %23 by %c15_i32_12 dim 1 : vector<8x512xf32>, i32 -> vector<8x512xf32>
    %c1_i32_13 = arith.constant 1 : i32
    %27 = tpu.dynamic_rotate %23 by %c1_i32_13 dim 1 : vector<8x512xf32>, i32 -> vector<8x512xf32>
    %c511_i32_14 = arith.constant 511 : i32
    %28 = tpu.dynamic_rotate %23 by %c511_i32_14 dim 1 : vector<8x512xf32>, i32 -> vector<8x512xf32>
    %c497_i32_15 = arith.constant 497 : i32
    %29 = tpu.dynamic_rotate %23 by %c497_i32_15 dim 1 : vector<8x512xf32>, i32 -> vector<8x512xf32>
    %c496_i32_16 = arith.constant 496 : i32
    %30 = tpu.dynamic_rotate %23 by %c496_i32_16 dim 1 : vector<8x512xf32>, i32 -> vector<8x512xf32>
    %c495_i32_17 = arith.constant 495 : i32
    %31 = tpu.dynamic_rotate %23 by %c495_i32_17 dim 1 : vector<8x512xf32>, i32 -> vector<8x512xf32>
    %32 = tpu.concatenate %24, %25, %26, %27, %23, %28, %29, %30, %31 in 0 : vector<8x512xf32>, vector<8x512xf32>, vector<8x512xf32>, vector<8x512xf32>, vector<8x512xf32>, vector<8x512xf32>, vector<8x512xf32>, vector<8x512xf32>, vector<8x512xf32> -> vector<72x512xf32>
    %33 = arith.mulf %32, %2 : vector<72x512xf32>
    %34 = arith.truncf %33 : vector<72x512xf32> to vector<72x512xbf16>
    %cst_18 = arith.constant dense<0.000000e+00> : vector<8x512xf32>
    %35 = tpu.matmul %1, %34, %cst_18 {dimension_numbers = #tpu.dot_dimension_numbers<[1], [0], [0], [1], [0, 0, 1, 1], [], []>} : vector<8x72xbf16>, vector<72x512xbf16>, vector<8x512xf32> -> vector<8x512xf32>
    %36 = arith.addf %35, %3 : vector<8x512xf32>
    %c0_19 = arith.constant 0 : index
    %c0_20 = arith.constant 0 : index
    %37 = vector.load %arg5[%c0_19, %c0_20] : memref<8x512xf32, #tpu.memory_space<vmem>>, vector<8x512xf32>
    tpu.vector_store %arg5[%c0_19, %c0_20], %36 {strides = array<i32>} : memref<8x512xf32, #tpu.memory_space<vmem>>, vector<8x512xf32>,
    return
  }
  func.func @transform_0(%arg0: i32) -> (i32, i32) {
    %c0_i32 = arith.constant 0 : i32
    %c0_i32_0 = arith.constant 0 : i32
    %c0_i32_1 = arith.constant 0 : i32
    return %c0_i32, %c0_i32_0 : i32, i32
  }
  func.func @transform_1(%arg0: i32) -> (i32, i32) {
    %c0_i32 = arith.constant 0 : i32
    %c0_i32_0 = arith.constant 0 : i32
    %c0_i32_1 = arith.constant 0 : i32
    return %c0_i32, %c0_i32_0 : i32, i32
  }
  func.func @transform_2(%arg0: i32) -> (i32, i32) {
    %c0_i32 = arith.constant 0 : i32
    %c0_i32_0 = arith.constant 0 : i32
    %c0_i32_1 = arith.constant 0 : i32
    return %c0_i32, %c0_i32_0 : i32, i32
  }
  func.func @transform_3(%arg0: i32) -> (i32, i32) {
    %c0_i32 = arith.constant 0 : i32
    %c0_i32_0 = arith.constant 0 : i32
    %c0_i32_1 = arith.constant 0 : i32
    return %c0_i32, %c0_i32_0 : i32, i32
  }
  func.func @transform_4(%arg0: i32) -> (i32, i32) {
    %c0_i32 = arith.constant 0 : i32
    %c0_i32_0 = arith.constant 0 : i32
    %c0_i32_1 = arith.constant 0 : i32
    return %c0_i32, %c0_i32_0 : i32, i32
  }
}

</mosaic_0001>

<bundles_post_ra>
// kernel: tpu_custom_call.1
= control target key start
LH: loop header
LB: loop body
LE: loop exit
PB: predicated region body
PF: predicated region fallthrough
CT: control target
= control target key end

     0   :  { %9 = vsyncpa [#allocation3], 0  ;;  %s1592_s0 = inlined_call_operand.hbm [shape: f32[8,512], index: 0, kind: input, shape index: {}]   ;;  %s1593_s1 = inlined_call_operand.hbm [shape: bf16[8,72], index: 1, kind: input, shape index: {}]   ;;  %s1594_s2 = inlined_call_operand.hbm [shape: bf16[8,72], index: 2, kind: input, shape index: {}]   ;;  %s1595_s3 = inlined_call_operand.hbm [shape: f32[72,512], index: 3, kind: input, shape index: {}]   ;;  %s1596_s4 = inlined_call_operand.hbm [shape: f32[8,512], index: 4, kind: output, shape index: {}]  }
   0x1   :  { %10 = vsyncpa [#allocation6], 0 }
   0x2   :  { %11 = vsyncpa [#allocation9], 0  ;;  %s29_s17 = sshll.u32 %s1593_s1, 4  ;;  %s30_s17 = int_to_ptr.hbm [resolvable:$true] %s29_s17 }
   0x3   :  { %12 = vsyncpa [#allocation4], 0  ;;  %s934_s18 = smov [#allocation5]   ;;  %s18_s22 = sshll.u32 %s1592_s0, 4  ;;  %s19_s22 = int_to_ptr.hbm [resolvable:$true] %s18_s22 }
   0x4   :  { %s31_s19 = sshll.u32 %s934_s18, 4  ;;  %s935_s23 = smov [#allocation2]   ;;  %s32_s19 = int_to_ptr.vmem [resolvable:$true] %s31_s19 }
   0x5   :  { %34 = dma.hbm_to_vmem [thread:$0]  %s30_s17, 64, %s32_s19, [#allocation6]  }
   0x6   :  { %s20_s24 = sshll.u32 %s935_s23, 4  ;;  %s40_s27 = sshll.u32 %s1594_s2, 4  ;;  %s21_s24 = int_to_ptr.vmem [resolvable:$true] %s20_s24  ;;  %s41_s27 = int_to_ptr.hbm [resolvable:$true] %s40_s27 }
   0x7   :  { %23 = dma.hbm_to_vmem [thread:$0]  %s19_s22, 512, %s21_s24, [#allocation3]  }
   0x8   :  { %s50_s29 = sshll.u32 %s1595_s3, 4  ;;  %s936_s30 = smov [#allocation7]   ;;  %s51_s29 = int_to_ptr.hbm [resolvable:$true] %s50_s29 }
   0x9   :  { %s42_s5 = sshll.u32 %s936_s30, 4  ;;  %s937_s0 = smov [#allocation8]   ;;  %s43_s5 = int_to_ptr.vmem [resolvable:$true] %s42_s5 }
   0xa   :  { %45 = dma.hbm_to_vmem [thread:$0]  %s41_s27, 64, %s43_s5, [#allocation6]  }
   0xb   :  { %s52_s6 = sshll.u32 %s937_s0, 4  ;;  %s938_s7 = smov 512   ;;  %s53_s6 = int_to_ptr.vmem [resolvable:$true] %s52_s6 }
   0xc   :  { %s939_s8 = smov 32  }
   0xd   :  { %58 = dma.hbm_to_vmem [thread:$0]  %s51_s29, 4608, %s53_s6, [#allocation9], %s938_s7, %s938_s7, %s939_s8  }
   0xe   :  { %926 = dma.done.wait [#allocation3], 512  }
   0xf   :  { %927 = vsyncadd [#allocation3], 4294966784 }
  0x10   :  { %928 = dma.done.wait [#allocation6], 128  }
  0x11   :  { %929 = vsyncadd [#allocation6], 4294967168 }
  0x12   :  { %930 = dma.done.wait [#allocation9], 4608  }
  0x13   :  { %931 = vsyncadd [#allocation9], 4294962688  ;;  %v986_v0 = vld [vmem:[#allocation2 + $0x18] sm:$0xff]  ;;  %v988_v1 = vld [vmem:[#allocation2 + $0x10] sm:$0xff]  ;;  %s940_s2 = smov 111   ;;  %s941_s3 = smov 113   ;;  %v126_v6 = vlaneseq }
  0x14   :  { %v990_v2 = vld [vmem:[#allocation2] sm:$0xff]  ;;  %217 = vrot.lane.b32.xlu1 %v986_v0, %s940_s2  ;;  %189 = vrot.lane.b32.xlu2 %v988_v1, %s941_s3  ;;  %s942_s9 = smov 112   ;;  %v1010_v3 = vld [vmem:[#allocation2 + $0x8] sm:$0xff]  ;;  %s943_s10 = smov 127   ;;  %vm284_vm1 = vcmask 1043456   ;;  %v1071_v18 = vld [vmem:[#allocation8 + $0x110] sm:$0xff] }
  0x15   :  { %211 = vrot.lane.b32.xlu0 %v990_v2, %s940_s2  ;;  %s944_s11 = smov 15   ;;  %s945_s12 = smov 1   ;;  %v1060_v7 = vand.u32 127, %v126_v6  ;;  %v1063_v10 = vld [vmem:[#allocation8 + $0x118] sm:$0xff]  ;;  %v1078_v23 = vld [vmem:[#allocation8 + $0xd0] sm:$0xff]  ;;  %v1102_v42 = vld [vmem:[#allocation8 + $0x100] sm:$0xff] }
  0x16   :  { %s946_s13 = smov 17   ;;  %s947_s14 = smov 16   ;;  %v1084_v26 = vld [vmem:[#allocation8 + $0xf0] sm:$0xff]  ;;  %v1086_v27 = vld [vmem:[#allocation8 + $0xd8] sm:$0xff]  ;;  %v1104_v43 = vld [vmem:[#allocation8 + $0x108] sm:$0xff]  ;;  %vm1607_vm9 = vcmask 588800  }
  0x17   :  { %vm219_vm0 = vcmp.lt.s32.totalorder %v1060_v7, 111  ;;  %vm193_vm2 = vcmp.lt.s32.totalorder %v1060_v7, 113  ;;  %vm206_vm3 = vcmp.lt.s32.totalorder %v1060_v7, 112  ;;  %v1090_v30 = vld [vmem:[#allocation8 + $0xf8] sm:$0xff]  ;;  %v1114_v52 = vld [vmem:[#allocation8 + $0x90] sm:$0xff]  ;;  %v1118_v54 = vld [vmem:[#allocation8 + $0xe8] sm:$0xff] }
  0x18   :  { %v1116_v53 = vld [vmem:[#allocation8 + $0x98] sm:$0xff]  ;;  %v1122_v56 = vld [vmem:[#allocation8 + $0xe0] sm:$0xff]  ;;  %v1130_v61 = vld [vmem:[#allocation8 + $0xc8] sm:$0xff]  ;;  %vm180_vm4 = vcmp.lt.s32.totalorder %v1060_v7, 127  ;;  %v242_v6 = vmul.f32 %v988_v1, %v1114_v52  ;;  %vm154_vm5 = vcmp.lt.s32.totalorder %v1060_v7, 15  ;;  %vm167_vm6 = vcmp.lt.s32.totalorder %v1060_v7, 1 }
  0x19   :  { %v1128_v60 = vld [vmem:[#allocation8 + $0xc0] sm:$0xff]  ;;  %v1133_v63 = vld [vmem:[#allocation8 + $0xb0] sm:$0xff]  ;;  %vm1610_vm7 = vcmp.lt.s32.totalorder %v1060_v7, 17  ;;  %vm1609_vm8 = vcmp.lt.s32.totalorder %v1060_v7, 16  ;;  %s948_s15 = smov [#allocation10]   ;;  %s755_s19 = sshll.u32 %s1596_s4, 4  ;;  %s756_s19 = int_to_ptr.hbm [resolvable:$true] %s755_s19 }
  0x1a   :  { %s753_s16 = sshll.u32 %s948_s15, 4  ;;  %s754_s16 = int_to_ptr.vmem [resolvable:$true] %s753_s16 }
  0x1c   :  { %191 = vrot.lane.b32.xlu2 %v986_v0, %s941_s3  ;;  %185 = vrot.lane.b32.xlu1 %v990_v2, %s941_s3 }
  0x1d   :  { %215 = vrot.lane.b32.xlu0 %v988_v1, %s940_s2 }
  0x24   :  { %204 = vrot.lane.b32.xlu2 %v986_v0, %s942_s9  ;;  %202 = vrot.lane.b32.xlu1 %v988_v1, %s942_s9 }
  0x25   :  { %198 = vrot.lane.b32.xlu0 %v990_v2, %s942_s9 }
  0x2c   :  { %176 = vrot.lane.b32.xlu2 %v988_v1, %s943_s10  ;;  %172 = vrot.lane.b32.xlu1 %v990_v2, %s943_s10 }
  0x2d   :  { %213 = vrot.lane.b32.xlu0 %v1010_v3, %s940_s2 }
  0x34   :  { %200 = vrot.lane.b32.xlu2 %v1010_v3, %s942_s9  ;;  %187 = vrot.lane.b32.xlu1 %v1010_v3, %s941_s3 }
  0x35   :  { %178 = vrot.lane.b32.xlu0 %v986_v0, %s943_s10 }
  0x3c   :  { %152 = vrot.lane.b32.xlu2 %v986_v0, %s944_s11  ;;  %150 = vrot.lane.b32.xlu1 %v988_v1, %s944_s11 }
  0x3d   :  { %148 = vrot.lane.b32.xlu0 %v1010_v3, %s944_s11 }
  0x44   :  { %165 = vrot.lane.b32.xlu2 %v986_v0, %s945_s12  ;;  %163 = vrot.lane.b32.xlu1 %v988_v1, %s945_s12 }
  0x45   :  { %161 = vrot.lane.b32.xlu0 %v1010_v3, %s945_s12 }
  0x4c   :  { %122 = vrot.lane.b32.xlu2 %v988_v1, %s946_s13  ;;  %120 = vrot.lane.b32.xlu1 %v1010_v3, %s946_s13 }
  0x4d   :  { %174 = vrot.lane.b32.xlu0 %v1010_v3, %s943_s10 }
  0x54   :  { %137 = vrot.lane.b32.xlu2 %v988_v1, %s947_s14  ;;  %135 = vrot.lane.b32.xlu1 %v1010_v3, %s947_s14 }
  0x55   :  { %124 = vrot.lane.b32.xlu0 %v986_v0, %s946_s13 }
  0x5c   :  { %159 = vrot.lane.b32.xlu2 %v990_v2, %s945_s12  ;;  %146 = vrot.lane.b32.xlu1 %v990_v2, %s944_s11 }
  0x5d   :  { %139 = vrot.lane.b32.xlu0 %v986_v0, %s947_s14 }
  0x64   :  { %133 = vrot.lane.b32.xlu1 %v990_v2, %s947_s14 }
  0x65   :  { %118 = vrot.lane.b32.xlu0 %v990_v2, %s946_s13 }
  0x6e   :  { %v1058_v4 = vpop.permute.xlu2 %189 }
  0x76   :  { %v192_v5 = vpop.permute.xlu2 %191 }
  0x77   :  { %v194_v24 = vsel %vm193_vm2, %v1058_v4, %v192_v5 }
  0x78   :  { %v250_v33 = vmul.f32 %v194_v24, %v1078_v23 }
  0x7e   :  { %v205_v8 = vpop.permute.xlu2 %204 }
  0x86   :  { %v218_v9 = vpop.permute.xlu1 %217  ;;  %v1069_v16 = vpop.permute.xlu2 %176 }
  0x87   :  { %v212_v11 = vpop.permute.xlu0 %211 }
  0x88   :  { %v223_v12 = vsel %vm219_vm0, %v218_v9, %v212_v11 }
  0x89   :  { %v259_v13 = vmul.f32 %v223_v12, %v1063_v10 }
  0x8b   :  { %v279_v14 = vpack.c.bf16 %v259_v13, %v259_v13 }
  0x8d   :  { %v295_v15 = vsel %vm284_vm1, %v279_v14, 0 }
  0x8e   :  { %339 = vmatpush.bf16.msra.mxu3 %v295_v15  ;;  %v186_v17 = vpop.permute.xlu1 %185  ;;  %v201_v34 = vpop.permute.xlu2 %200 }
  0x8f   :  { %v216_v19 = vpop.permute.xlu0 %215  ;;  %v197_v28 = vsel %vm193_vm2, %v192_v5, %v186_v17  ;;  %v1135_v5 = vld [vmem:[#allocation8 + $0xb8] sm:$0xff] }
  0x90   :  { %v220_v20 = vsel %vm219_vm0, %v216_v19, %v218_v9  ;;  %v251_v37 = vmul.f32 %v197_v28, %v1086_v27 }
  0x91   :  { %v258_v21 = vmul.f32 %v220_v20, %v1071_v18 }
  0x93   :  { %v278_v22 = vpack.c.bf16 %v258_v21, %v258_v21 }
  0x95   :  { %v292_v25 = vsel %vm284_vm1, %v278_v22, 0 }
  0x96   :  { %326 = vmatpush.bf16.msra.mxu2 %v292_v25  ;;  %v203_v29 = vpop.permute.xlu1 %202  ;;  %v1112_v49 = vpop.permute.xlu2 %152 }
  0x97   :  { %v207_v31 = vsel %vm206_vm3, %v203_v29, %v205_v8  ;;  %v199_v32 = vpop.permute.xlu0 %198  ;;  %v208_v55 = vsel %vm206_vm3, %v201_v34, %v203_v29 }
  0x98   :  { %v254_v35 = vmul.f32 %v207_v31, %v1084_v26  ;;  %v210_v36 = vsel %vm206_vm3, %v205_v8, %v199_v32  ;;  %v209_v57 = vsel %vm206_vm3, %v199_v32, %v201_v34  ;;  %v243_v8 = vmul.f32 %v986_v0, %v1116_v53  ;;  %v1162_v31 = vld [vmem:[#allocation8 + $0x58] sm:$0xff] }
  0x99   :  { %v255_v38 = vmul.f32 %v210_v36, %v1090_v30  ;;  %v253_v9 = vmul.f32 %v208_v55, %v1118_v54  ;;  %v1184_v55 = vld [vmem:[#allocation8 + $0x80] sm:$0xff] }
  0x9a   :  { %v274_v39 = vpack.c.bf16 %v254_v35, %v250_v33  ;;  %v1167_v33 = vld [vmem:[#allocation8 + $0x78] sm:$0xff]  ;;  %v1169_v35 = vld [vmem:[#allocation8 + $0x50] sm:$0xff] }
  0x9b   :  { %v275_v40 = vpack.c.bf16 %v255_v38, %v251_v37  ;;  %1613 = vst [vmem:[#allocation15_spill] sm:$0xff] %v1167_v33  ;;  %v1174_v38 = vld [vmem:[#allocation8 + $0x70] sm:$0xff] }
  0x9c   :  { %327 = vmatpush.bf16.msra.mxu2 %v274_v39 }
  0x9d   :  { %340 = vmatpush.bf16.msra.mxu3 %v275_v40 }
  0x9e   :  { %v1100_v41 = vpop.permute.xlu1 %172  ;;  %v166_v25 = vpop.permute.xlu2 %165 }
  0x9f   :  { %v214_v44 = vpop.permute.xlu0 %213 }
  0xa0   :  { %v221_v45 = vsel %vm219_vm0, %v214_v44, %v216_v19  ;;  %v222_v46 = vsel %vm219_vm0, %v212_v11, %v214_v44  ;;  %v252_v11 = vmul.f32 %v209_v57, %v1122_v56  ;;  %v1186_v57 = vld [vmem:[#allocation8 + $0x88] sm:$0xff] }
  0xa1   :  { %v256_v47 = vmul.f32 %v222_v46, %v1102_v42  ;;  %v257_v48 = vmul.f32 %v221_v45, %v1104_v43 }
  0xa3   :  { %v276_v50 = vpack.c.bf16 %v256_v47, %v256_v47  ;;  %v277_v51 = vpack.c.bf16 %v257_v48, %v257_v48 }
  0xa5   :  { %v286_v58 = vsel %vm284_vm1, %v276_v50, 0  ;;  %v289_v59 = vsel %vm284_vm1, %v277_v51, 0 }
  0xa6   :  { %300 = vmatpush.bf16.msra.mxu0 %v286_v58  ;;  %313 = vmatpush.bf16.msra.mxu1 %v289_v59  ;;  %v188_v62 = vpop.permute.xlu1 %187  ;;  %v123_v34 = vpop.permute.xlu2 %122  ;;  %v1190_v59 = vld [vmem:[#allocation8 + $0xa0] sm:$0xff] }
  0xa7   :  { %v195_v12 = vsel %vm193_vm2, %v188_v62, %v1058_v4  ;;  %v196_v13 = vsel %vm193_vm2, %v186_v17, %v188_v62  ;;  %v179_v14 = vpop.permute.xlu0 %178  ;;  %v1192_v62 = vld [vmem:[#allocation8 + $0xa8] sm:$0xff] }
  0xa8   :  { %v248_v15 = vmul.f32 %v196_v13, %v1128_v60  ;;  %v249_v19 = vmul.f32 %v195_v12, %v1130_v61  ;;  %v181_v0 = vsel %vm180_vm4, %v1069_v16, %v179_v14  ;;  %v184_v1 = vsel %vm180_vm4, %v179_v14, %v1100_v41 }
  0xa9   :  { %v246_v20 = vmul.f32 %v181_v0, %v1133_v63  ;;  %v247_v4 = vmul.f32 %v184_v1, %v1135_v5  ;;  %v1213_v0 = vld [vmem:[#allocation8 + $0x30] sm:$0xff] }
  0xaa   :  { %v272_v21 = vpack.c.bf16 %v252_v11, %v248_v15  ;;  %v273_v22 = vpack.c.bf16 %v253_v9, %v249_v19  ;;  %v241_v9 = vmul.f32 %v1010_v3, %v1186_v57  ;;  %v1208_v3 = vld [vmem:[#allocation8 + $0x10] sm:$0xff]  ;;  %1615 = vst [vmem:[#allocation17_spill] sm:$0xff] %v1213_v0 }
  0xab   :  { %v270_v17 = vpack.c.bf16 %v246_v20, %v242_v6  ;;  %v271_v24 = vpack.c.bf16 %v247_v4, %v243_v8  ;;  %v240_v8 = vmul.f32 %v990_v2, %v1184_v55  ;;  %1614 = vst [vmem:[#allocation16_spill] sm:$0xff] %v1208_v3 }
  0xac   :  { %301 = vmatpush.bf16.msra.mxu0 %v272_v21  ;;  %314 = vmatpush.bf16.msra.mxu1 %v273_v22 }
  0xad   :  { %328 = vmatpush.bf16.msra.mxu2 %v270_v17  ;;  %341 = vmatpush.bf16.msra.mxu3 %v271_v24  ;;  %v1219_v24 = vld [vmem:[#allocation8 + $0x60] sm:$0xff] }
  0xae   :  { %v151_v28 = vpop.permute.xlu1 %150  ;;  %v138_v11 = vpop.permute.xlu2 %137  ;;  %1616 = vst [vmem:[#allocation18_spill] sm:$0xff] %v1219_v24 }
  0xaf   :  { %v1158_v29 = vpop.permute.xlu0 %148  ;;  %v155_v32 = vsel %vm154_vm5, %v151_v28, %v1112_v49 }
  0xb0   :  { %v156_v36 = vsel %vm154_vm5, %v1158_v29, %v151_v28  ;;  %v235_v44 = vmul.f32 %v155_v32, %v1162_v31  ;;  %v76_v32 = vld [vmem:[#allocation5] sm:$0xf] }
  0xb1   :  { %v234_v47 = vmul.f32 %v156_v36, %v1169_v35  ;;  %v1223_v36 = vld [vmem:[#allocation8 + $0x68] sm:$0xff] }
  0xb2   :  { %1617 = vst [vmem:[#allocation19_spill] sm:$0xff] %v1223_v36 }
  0xb6   :  { %v164_v37 = vpop.permute.xlu1 %163  ;;  %v160_v22 = vpop.permute.xlu2 %159 }
  0xb7   :  { %v168_v39 = vsel %vm167_vm6, %v164_v37, %v166_v25  ;;  %v162_v40 = vpop.permute.xlu0 %161  ;;  %v171_v28 = vsel %vm167_vm6, %v166_v25, %v160_v22 }
  0xb8   :  { %v239_v45 = vmul.f32 %v168_v39, %v1167_v33  ;;  %v169_v46 = vsel %vm167_vm6, %v162_v40, %v164_v37  ;;  %v170_v37 = vsel %vm167_vm6, %v160_v22, %v162_v40  ;;  %v1227_v39 = vld [vmem:[#allocation8 + $0x40] sm:$0xff]  ;;  %v236_v25 = vmul.f32 %v171_v28, %v1219_v24 }
  0xb9   :  { %v238_v48 = vmul.f32 %v169_v46, %v1174_v38  ;;  %1618 = vst [vmem:[#allocation20_spill] sm:$0xff] %v1227_v39 }
  0xba   :  { %v267_v50 = vpack.c.bf16 %v239_v45, %v235_v44  ;;  %v1229_v44 = vld [vmem:[#allocation8 + $0x48] sm:$0xff]  ;;  %v1231_v45 = vld [vmem:[#allocation8 + $0x18] sm:$0xff] }
  0xbb   :  { %v266_v51 = vpack.c.bf16 %v238_v48, %v234_v47  ;;  %1619 = vst [vmem:[#allocation21_spill] sm:$0xff] %v1229_v44  ;;  %v1235_v48 = vld [vmem:[#allocation8 + $0x38] sm:$0xff] }
  0xbc   :  { %342 = vmatpush.bf16.msra.mxu3 %v267_v50  ;;  %1620 = vst [vmem:[#allocation22_spill] sm:$0xff] %v1231_v45 }
  0xbd   :  { %329 = vmatpush.bf16.msra.mxu2 %v266_v51  ;;  %1621 = vst [vmem:[#allocation23_spill] sm:$0xff] %v1235_v48 }
  0xbe   :  { %v1188_v58 = vpop.permute.xlu1 %120 }
  0xbf   :  { %v175_v6 = vpop.permute.xlu0 %174 }
  0xc0   :  { %v182_v12 = vsel %vm180_vm4, %v175_v6, %v1069_v16  ;;  %v183_v13 = vsel %vm180_vm4, %v1100_v41, %v175_v6  ;;  %v130_v16 = vsel %vm1610_vm7, %v1188_v58, %v123_v34  ;;  %v237_v6 = vmul.f32 %v170_v37, %v1223_v36 }
  0xc1   :  { %v244_v14 = vmul.f32 %v183_v13, %v1190_v59  ;;  %v245_v15 = vmul.f32 %v182_v12, %v1192_v62  ;;  %v226_v4 = vmul.f32 %v130_v16, %v1208_v3  ;;  %v1256_v16 = vld [vmem:[#allocation8] sm:$0xff] }
  0xc2   :  { %1624 = vst [vmem:[#allocation26_spill] sm:$0xff] %v1256_v16 }
  0xc3   :  { %v268_v19 = vpack.c.bf16 %v244_v14, %v240_v8  ;;  %v269_v2 = vpack.c.bf16 %v245_v15, %v241_v9 }
  0xc5   :  { %302 = vmatpush.bf16.msra.mxu0 %v268_v19  ;;  %315 = vmatpush.bf16.msra.mxu1 %v269_v2  ;;  %v1254_v19 = vld [vmem:[#allocation8 + $0x28] sm:$0xff] }
  0xc6   :  { %v136_v41 = vpop.permute.xlu1 %135  ;;  %1623 = vst [vmem:[#allocation25_spill] sm:$0xff] %v1254_v19 }
  0xc7   :  { %v143_v1 = vsel %vm1609_vm8, %v136_v41, %v138_v11  ;;  %v125_v20 = vpop.permute.xlu0 %124 }
  0xc8   :  { %v230_v21 = vmul.f32 %v143_v1, %v1213_v0  ;;  %v129_v46 = vsel %vm1610_vm7, %v123_v34, %v125_v20  ;;  %v1258_v1 = vld [vmem:[#allocation8 + $0x8] sm:$0xff] }
  0xc9   :  { %v227_v12 = vmul.f32 %v129_v46, %v1231_v45  ;;  %1625 = vst [vmem:[#allocation27_spill] sm:$0xff] %v1258_v1 }
  0xca   :  { %v262_v17 = vpack.c.bf16 %v230_v21, %v226_v4 }
  0xcc   :  { %330 = vmatpush.bf16.msra.mxu2 %v262_v17 }
  0xce   :  { %v147_v47 = vpop.permute.xlu1 %146 }
  0xcf   :  { %v157_v50 = vsel %vm154_vm5, %v147_v47, %v1158_v29  ;;  %v158_v40 = vsel %vm154_vm5, %v1112_v49, %v147_v47  ;;  %v140_v51 = vpop.permute.xlu0 %139  ;;  %769 = vmatmul.msk.bf16.vlgmr.msra.gmra.mxu2 %vm1607_vm9, %v76_v32  ;;  %v1252_v49 = vld [vmem:[#allocation8 + $0x20] sm:$0xff] }
  0xd0   :  { %v232_v34 = vmul.f32 %v158_v40, %v1227_v39  ;;  %v233_v8 = vmul.f32 %v157_v50, %v1229_v44  ;;  %v142_v9 = vsel %vm1609_vm8, %v138_v11, %v140_v51  ;;  %1622 = vst [vmem:[#allocation24_spill] sm:$0xff] %v1252_v49 }
  0xd1   :  { %v231_v29 = vmul.f32 %v142_v9, %v1235_v48 }
  0xd2   :  { %v264_v13 = vpack.c.bf16 %v236_v25, %v232_v34  ;;  %v265_v14 = vpack.c.bf16 %v237_v6, %v233_v8 }
  0xd3   :  { %v263_v15 = vpack.c.bf16 %v231_v29, %v227_v12 }
  0xd4   :  { %303 = vmatpush.bf16.msra.mxu0 %v264_v13  ;;  %316 = vmatpush.bf16.msra.mxu1 %v265_v14 }
  0xd5   :  { %343 = vmatpush.bf16.msra.mxu3 %v263_v15 }
  0xd6   :  { %v134_v2 = vpop.permute.xlu1 %133 }
  0xd7   :  { %v144_v11 = vsel %vm1609_vm8, %v134_v2, %v136_v41  ;;  %v145_v4 = vsel %vm1609_vm8, %v140_v51, %v134_v2  ;;  %v119_v21 = vpop.permute.xlu0 %118 }
  0xd8   :  { %v228_v22 = vmul.f32 %v145_v4, %v1252_v49  ;;  %v229_v17 = vmul.f32 %v144_v11, %v1254_v19  ;;  %v131_v28 = vsel %vm1610_vm7, %v119_v21, %v1188_v58  ;;  %v132_v37 = vsel %vm1610_vm7, %v125_v20, %v119_v21  ;;  %770 = vmatmul.msk.bf16.vlgmr.msra.gmra.mxu3 %vm1607_vm9, %v76_v32 }
  0xd9   :  { %v224_v46 = vmul.f32 %v132_v37, %v1256_v16  ;;  %v225_v41 = vmul.f32 %v131_v28, %v1258_v1 }
  0xdb   :  { %v260_v47 = vpack.c.bf16 %v228_v22, %v224_v46  ;;  %v261_v25 = vpack.c.bf16 %v229_v17, %v225_v41 }
  0xdd   :  { %304 = vmatpush.bf16.msra.mxu0 %v260_v47  ;;  %317 = vmatpush.bf16.msra.mxu1 %v261_v25 }
  0xe0   :  { %767 = vmatmul.msk.bf16.vlgmr.msra.gmra.mxu0 %vm1607_vm9, %v76_v32  ;;  %768 = vmatmul.msk.bf16.vlgmr.msra.gmra.mxu1 %vm1607_vm9, %v76_v32 }
 0x152   :  { %v1276_v50 = vpop.f32.mrf.mxu2 }
 0x153   :  { %v1279_v58 = vmul.f32 0.70710677, %v1276_v50 }
 0x155   :  { %v437_v20 = vmul.f32 %v1279_v58, %v1279_v58 }
 0x157   :  { %v1283_v40 = vmin.f32 %v437_v20, 16.0 }
 0x159   :  { %v450_v6 = vmul.f32 3.8918573e-05, %v1283_v40 }
 0x15a   :  { %v334_v51 = vpop.f32.mrf.mxu2 }
 0x15b   :  { %v1286_v34 = vpop.f32.mrf.mxu3  ;;  %v451_v13 = vadd.f32 0.001143296, %v450_v6 }
 0x15c   :  { %v1289_v8 = vmul.f32 0.70710677, %v1286_v34 }
 0x15d   :  { %v1291_v9 = vpop.f32.mrf.mxu0  ;;  %v1293_v32 = vpop.f32.mrf.mxu1  ;;  %v452_v22 = vmul.f32 %v451_v13, %v1283_v40 }
 0x15e   :  { %v477_v12 = vmul.f32 %v1289_v8, %v1289_v8  ;;  %v1298_v29 = vmul.f32 0.70710677, %v1291_v9  ;;  %v1301_v14 = vmul.f32 0.70710677, %v1293_v32 }
 0x15f   :  { %v453_v13 = vadd.f32 0.014752088, %v452_v22 }
 0x160   :  { %v1303_v15 = vmin.f32 %v477_v12, 16.0  ;;  %v357_v2 = vmul.f32 %v1298_v29, %v1298_v29  ;;  %v397_v11 = vmul.f32 %v1301_v14, %v1301_v14 }
 0x162   :  { %v490_v4 = vmul.f32 3.8918573e-05, %v1303_v15  ;;  %v1310_v21 = vmin.f32 %v357_v2, 16.0  ;;  %v1313_v17 = vmin.f32 %v397_v11, 16.0  ;;  %v479_v37 = vmul.f32 2.1237322e-06, %v1303_v15 }
 0x163   :  { %v347_v28 = vpop.f32.mrf.mxu3 }
 0x164   :  { %v491_v46 = vadd.f32 0.001143296, %v490_v4  ;;  %v359_v41 = vmul.f32 2.1237322e-06, %v1310_v21  ;;  %v370_v47 = vmul.f32 3.8918573e-05, %v1310_v21 }
 0x165   :  { %v399_v25 = vmul.f32 2.1237322e-06, %v1313_v17  ;;  %v308_v20 = vpop.f32.mrf.mxu0  ;;  %v321_v51 = vpop.f32.mrf.mxu1  ;;  %v410_v2 = vmul.f32 3.8918573e-05, %v1313_v17  ;;  %v480_v19 = vadd.f32 0.00028619796, %v479_v37 }
 0x166   :  { %v492_v6 = vmul.f32 %v491_v46, %v1303_v15  ;;  %v360_v12 = vadd.f32 0.00028619796, %v359_v41  ;;  %v371_v11 = vadd.f32 0.001143296, %v370_v47  ;;  %v454_v20 = vmul.f32 %v453_v13, %v1283_v40 }
 0x167   :  { %v400_v49 = vadd.f32 0.00028619796, %v399_v25  ;;  %v411_v1 = vadd.f32 0.001143296, %v410_v2  ;;  %v481_v41 = vmul.f32 %v480_v19, %v1303_v15 }
 0x168   :  { %v493_v28 = vadd.f32 0.014752088, %v492_v6  ;;  %v372_v4 = vmul.f32 %v371_v11, %v1310_v21  ;;  %v361_v36 = vmul.f32 %v360_v12, %v1310_v21  ;;  %v455_v25 = vadd.f32 0.112945676, %v454_v20 }
 0x169   :  { %v412_v46 = vmul.f32 %v411_v1, %v1313_v17  ;;  %v401_v22 = vmul.f32 %v400_v49, %v1313_v17  ;;  %v482_v11 = vadd.f32 0.0036580483, %v481_v41 }
 0x16a   :  { %v494_v16 = vmul.f32 %v493_v28, %v1303_v15  ;;  %v373_v51 = vadd.f32 0.014752088, %v372_v4  ;;  %v362_v47 = vadd.f32 0.0036580483, %v361_v36  ;;  %v456_v49 = vmul.f32 %v455_v25, %v1283_v40 }
 0x16b   :  { %v413_v2 = vadd.f32 0.014752088, %v412_v46  ;;  %v402_v12 = vadd.f32 0.0036580483, %v401_v22  ;;  %v483_v4 = vmul.f32 %v482_v11, %v1303_v15 }
 0x16c   :  { %v495_v24 = vadd.f32 0.112945676, %v494_v16  ;;  %v374_v6 = vmul.f32 %v373_v51, %v1310_v21  ;;  %v363_v19 = vmul.f32 %v362_v47, %v1310_v21  ;;  %v439_v16 = vmul.f32 2.1237322e-06, %v1283_v40 }
 0x16d   :  { %v414_v13 = vmul.f32 %v413_v2, %v1313_v17  ;;  %v403_v51 = vmul.f32 %v402_v12, %v1313_v17  ;;  %v457_v47 = vadd.f32 0.4994258, %v456_v49  ;;  %v484_v25 = vadd.f32 0.05243302, %v483_v4 }
 0x16e   :  { %v496_v37 = vmul.f32 %v495_v24, %v1303_v15  ;;  %v375_v44 = vadd.f32 0.112945676, %v374_v6  ;;  %v364_v22 = vadd.f32 0.05243302, %v363_v19 }
 0x16f   :  { %v415_v36 = vadd.f32 0.112945676, %v414_v13  ;;  %v404_v2 = vadd.f32 0.05243302, %v403_v51  ;;  %v485_v19 = vmul.f32 %v484_v25, %v1303_v15 }
 0x170   :  { %v497_v28 = vadd.f32 0.4994258, %v496_v37  ;;  %v376_v24 = vmul.f32 %v375_v44, %v1310_v21  ;;  %v440_v37 = vadd.f32 0.00028619796, %v439_v16  ;;  %v365_v11 = vmul.f32 %v364_v22, %v1310_v21 }
 0x171   :  { %v416_v41 = vmul.f32 %v415_v36, %v1313_v17  ;;  %v405_v16 = vmul.f32 %v404_v2, %v1313_v17  ;;  %v486_v22 = vadd.f32 0.18741608, %v485_v19 }
 0x172   :  { %v498_v1 = vmul.f32 %v497_v28, %v1303_v15  ;;  %v377_v46 = vadd.f32 0.4994258, %v376_v24  ;;  %v441_v12 = vmul.f32 %v440_v37, %v1283_v40  ;;  %v458_v24 = vmul.f32 %v457_v47, %v1283_v40 }
 0x173   :  { %v417_v44 = vadd.f32 0.4994258, %v416_v41  ;;  %v366_v4 = vadd.f32 0.18741608, %v365_v11  ;;  %v406_v37 = vadd.f32 0.18741608, %v405_v16  ;;  %v487_v11 = vmul.f32 %v486_v22, %v1303_v15 }
 0x174   :  { %v1337_v20 = vadd.f32 1.0, %v498_v1  ;;  %v378_v6 = vmul.f32 %v377_v46, %v1310_v21  ;;  %v442_v51 = vadd.f32 0.0036580483, %v441_v12  ;;  %v1353_v41 = vadd.f32 1.0, %v458_v24 }
 0x175   :  { %v418_v13 = vmul.f32 %v417_v44, %v1313_v17  ;;  %v367_v44 = vmul.f32 %v366_v4, %v1310_v21  ;;  %v407_v12 = vmul.f32 %v406_v37, %v1313_v17 }
 0x176   :  { %794 = vrcp.f32 %v1337_v20  ;;  %v379_v28 = vadd.f32 1.0, %v378_v6  ;;  %v443_v25 = vmul.f32 %v442_v51, %v1283_v40  ;;  %vm505_vm10 = vweird.f32 %v1337_v20 }
 0x177   :  { %v419_v49 = vadd.f32 1.0, %v418_v13  ;;  %v509_v24 = vand.u32 2147483647, %v1337_v20  ;;  %v368_v21 = vadd.f32 1.1283791, %v367_v44 }
 0x178   :  { %796 = vrcp.f32 %v379_v28  ;;  %v391_v19 = vand.u32 2147483648, %v379_v28  ;;  %v389_v4 = vand.u32 2147483647, %v379_v28  ;;  %vm385_vm13 = vweird.f32 %v379_v28 }
 0x179   :  { %798 = vrcp.f32 %v419_v49  ;;  %v408_v17 = vadd.f32 1.1283791, %v407_v12  ;;  %v431_v37 = vand.u32 2147483648, %v419_v49  ;;  %v429_v3 = vand.u32 2147483647, %v419_v49 }
 0x17a   :  { %800 = vrcp.f32 %v1353_v41  ;;  %v369_v48 = vmul.f32 %v368_v21, %v1298_v29  ;;  %vm390_vm8 = vcmp.eq.f32.partialorder %v389_v4, 8.507059e+37  ;;  %vm510_vm7 = vcmp.eq.f32.partialorder %v509_v24, 8.507059e+37 }
 0x17b   :  { %v444_v33 = vadd.f32 0.05243302, %v443_v25 }
 0x17c   :  { %v1346_v1 = vpop.eup %794 }
 0x17d   :  { %v501_v36 = vmul.f32 %v1346_v1, %v1337_v20  ;;  %vm506_vm12 = vweird.f32 %v1346_v1  ;;  %v445_v24 = vmul.f32 %v444_v33, %v1283_v40 }
 0x17e   :  { %v797_v6 = vpop.eup %796  ;;  %vm1368_vm9 = vmor %vm505_vm10, %vm506_vm12  ;;  %vm430_vm10 = vcmp.eq.f32.partialorder %v429_v3, 8.507059e+37  ;;  %v350_v3 = vmul.f32 0.5, %v1293_v32  ;;  %v471_v32 = vand.u32 2147483648, %v1353_v41 }
 0x17f   :  { %v502_v46 = vsub.f32 1.0, %v501_v36  ;;  %v381_v47 = vmul.f32 %v797_v6, %v379_v28  ;;  %v799_v13 = vpop.eup %798  ;;  %vm386_vm11 = vweird.f32 %v797_v6 }
 0x180   :  { %v421_v16 = vmul.f32 %v799_v13, %v419_v49  ;;  %vm387_vm14 = vmor %vm385_vm13, %vm386_vm11  ;;  %vm426_vm15 = vweird.f32 %v799_v13  ;;  %v801_v44 = vpop.eup %800  ;;  %vm425_vm11 = vweird.f32 %v419_v49 }
 0x181   :  { %v503_v2 = vmul.f32 %v1346_v1, %v502_v46  ;;  %v382_v39 = vsub.f32 1.0, %v381_v47  ;;  %v511_v46 = vand.u32 2147483648, %v1337_v20  ;;  %v392_v47 = vor.u32 1.1754944e-38, %v391_v19  ;;  %vm427_vm13 = vmor %vm425_vm11, %vm426_vm15 }
 0x182   :  { %v422_v15 = vsub.f32 1.0, %v421_v16  ;;  %v409_v20 = vmul.f32 %v408_v17, %v1301_v14 }
 0x183   :  { %v383_v36 = vmul.f32 %v797_v6, %v382_v39  ;;  %v504_v51 = vadd.f32 %v1346_v1, %v503_v2  ;;  %v488_v39 = vadd.f32 1.1283791, %v487_v11  ;;  %v432_v11 = vor.u32 1.1754944e-38, %v431_v37 }
 0x184   :  { %v423_v45 = vmul.f32 %v799_v13, %v422_v15  ;;  %v352_v37 = vmul.f32 0.5, %v1286_v34 }
 0x185   :  { %v384_v22 = vadd.f32 %v797_v6, %v383_v36  ;;  %v508_v28 = vsel %vm1368_vm9, %v1346_v1, %v504_v51  ;;  %v512_v36 = vor.u32 1.1754944e-38, %v511_v46  ;;  %v489_v4 = vmul.f32 %v488_v39, %v1289_v8 }
 0x186   :  { %v424_v19 = vadd.f32 %v799_v13, %v423_v45  ;;  %v461_v1 = vmul.f32 %v801_v44, %v1353_v41  ;;  %v349_v45 = vmul.f32 0.5, %v1291_v9  ;;  %v446_v9 = vadd.f32 0.18741608, %v445_v24 }
 0x187   :  { %v388_v16 = vsel %vm387_vm14, %v797_v6, %v384_v22  ;;  %v513_v29 = vsel %vm510_vm7, %v512_v36, %v508_v28  ;;  %vm465_vm7 = vweird.f32 %v1353_v41  ;;  %v469_v39 = vand.u32 2147483647, %v1353_v41 }
 0x188   :  { %v393_v12 = vsel %vm390_vm8, %v392_v47, %v388_v16  ;;  %v428_v0 = vsel %vm427_vm13, %v799_v13, %v424_v19  ;;  %v462_v25 = vsub.f32 1.0, %v461_v1  ;;  %v447_v17 = vmul.f32 %v446_v9, %v1283_v40 }
 0x189   :  { %v394_v15 = vmul.f32 %v393_v12, %v369_v48  ;;  %v433_v21 = vsel %vm430_vm10, %v432_v11, %v428_v0  ;;  %v514_v48 = vmul.f32 %v513_v29, %v489_v4  ;;  %vm466_vm8 = vweird.f32 %v801_v44 }
 0x18a   :  { %v434_v22 = vmul.f32 %v433_v21, %v409_v20  ;;  %v463_v33 = vmul.f32 %v801_v44, %v462_v25  ;;  %vm467_vm9 = vmor %vm465_vm7, %vm466_vm8  ;;  %v448_v40 = vadd.f32 1.1283791, %v447_v17  ;;  %v472_v16 = vor.u32 1.1754944e-38, %v471_v32 }
 0x18b   :  { %v771_v6 = vclamps-f32 %v394_v15, 1.0  ;;  %v774_v0 = vclamps-f32 %v514_v48, 1.0  ;;  %vm470_vm12 = vcmp.eq.f32.partialorder %v469_v39, 8.507059e+37 }
 0x18c   :  { %v772_v51 = vclamps-f32 %v434_v22, 1.0  ;;  %v464_v47 = vadd.f32 %v801_v44, %v463_v33  ;;  %v449_v34 = vmul.f32 %v448_v40, %v1279_v58  ;;  %v351_v58 = vmul.f32 0.5, %v1276_v50 }
 0x18d   :  { %v517_v49 = vadd.f32 1.0, %v771_v6  ;;  %v520_v13 = vadd.f32 1.0, %v774_v0 }
 0x18e   :  { %v518_v14 = vadd.f32 1.0, %v772_v51  ;;  %v468_v28 = vsel %vm467_vm9, %v801_v44, %v464_v47 }
 0x18f   :  { %v1381_v46 = vmul.f32 %v517_v49, %v349_v45  ;;  %v1401_v2 = vmul.f32 %v520_v13, %v352_v37  ;;  %v473_v12 = vsel %vm470_vm12, %v472_v16, %v468_v28 }
 0x190   :  { %v1388_v8 = vmul.f32 %v518_v14, %v350_v3  ;;  %v474_v41 = vmul.f32 %v473_v12, %v449_v34 }
 0x191   :  { %573 = vrot.lane.b32.xlu0 %v1381_v46, %s943_s10  ;;  %609 = vrot.lane.b32.xlu2 %v1381_v46, %s940_s2  ;;  %v637_v39 = vmul.f32 %v1381_v46, %v1184_v55 }
 0x192   :  { %599 = vrot.lane.b32.xlu1 %v1388_v8, %s942_s9  ;;  %v773_v19 = vclamps-f32 %v474_v41, 1.0 }
 0x194   :  { %v519_v44 = vadd.f32 1.0, %v773_v19 }
 0x196   :  { %v1419_v36 = vmul.f32 %v519_v44, %v351_v58 }
 0x199   :  { %587 = vrot.lane.b32.xlu0 %v1388_v8, %s941_s3  ;;  %585 = vrot.lane.b32.xlu2 %v1381_v46, %s941_s3 }
 0x19a   :  { %615 = vrot.lane.b32.xlu1 %v1401_v2, %s940_s2 }
 0x1a1   :  { %527 = vrot.lane.b32.xlu0 %v1388_v8, %s946_s13  ;;  %597 = vrot.lane.b32.xlu2 %v1381_v46, %s942_s9 }
 0x1a2   :  { %591 = vrot.lane.b32.xlu1 %v1401_v2, %s941_s3 }
 0x1a9   :  { %539 = vrot.lane.b32.xlu0 %v1388_v8, %s947_s14  ;;  %611 = vrot.lane.b32.xlu2 %v1388_v8, %s940_s2 }
 0x1aa   :  { %603 = vrot.lane.b32.xlu1 %v1401_v2, %s942_s9 }
 0x1b1   :  { %613 = vrot.lane.b32.xlu0 %v1419_v36, %s940_s2  ;;  %551 = vrot.lane.b32.xlu2 %v1388_v8, %s944_s11 }
 0x1b2   :  { %577 = vrot.lane.b32.xlu1 %v1419_v36, %s943_s10 }
 0x1b9   :  { %589 = vrot.lane.b32.xlu0 %v1419_v36, %s941_s3  ;;  %563 = vrot.lane.b32.xlu2 %v1388_v8, %s945_s12 }
 0x1ba   :  { %555 = vrot.lane.b32.xlu1 %v1401_v2, %s944_s11 }
 0x1c1   :  { %601 = vrot.lane.b32.xlu0 %v1419_v36, %s942_s9  ;;  %575 = vrot.lane.b32.xlu2 %v1388_v8, %s943_s10 }
 0x1c2   :  { %567 = vrot.lane.b32.xlu1 %v1401_v2, %s945_s12 }
 0x1c9   :  { %553 = vrot.lane.b32.xlu0 %v1419_v36, %s944_s11  ;;  %579 = vrot.lane.b32.xlu2 %v1401_v2, %s943_s10 }
 0x1ca   :  { %529 = vrot.lane.b32.xlu1 %v1419_v36, %s946_s13 }
 0x1d1   :  { %565 = vrot.lane.b32.xlu0 %v1419_v36, %s945_s12  ;;  %531 = vrot.lane.b32.xlu2 %v1401_v2, %s946_s13 }
 0x1d2   :  { %541 = vrot.lane.b32.xlu1 %v1419_v36, %s947_s14 }
 0x1d9   :  { %549 = vrot.lane.b32.xlu0 %v1381_v46, %s944_s11  ;;  %543 = vrot.lane.b32.xlu2 %v1401_v2, %s947_s14 }
 0x1da   :  { %561 = vrot.lane.b32.xlu1 %v1381_v46, %s945_s12 }
 0x1e1   :  { %537 = vrot.lane.b32.xlu0 %v1381_v46, %s947_s14  ;;  %525 = vrot.lane.b32.xlu2 %v1381_v46, %s946_s13 }
 0x1eb   :  { %v610_v50 = vpop.permute.xlu2 %609 }
 0x1f3   :  { %v586_v15 = vpop.permute.xlu2 %585 }
 0x1fb   :  { %v598_v11 = vpop.permute.xlu2 %597 }
 0x203   :  { %v574_v20 = vpop.permute.xlu0 %573  ;;  %v612_v29 = vpop.permute.xlu2 %611 }
 0x204   :  { %v619_v6 = vsel %vm219_vm0, %v610_v50, %v612_v29  ;;  %v600_v4 = vpop.permute.xlu1 %599 }
 0x205   :  { %v653_v21 = vmul.f32 %v619_v6, %v1102_v42  ;;  %v607_v45 = vsel %vm206_vm3, %v598_v11, %v600_v4 }
 0x206   :  { %v649_v24 = vmul.f32 %v607_v45, %v1122_v56 }
 0x207   :  { %v673_v22 = vpack.c.bf16 %v653_v21, %v653_v21 }
 0x209   :  { %v681_v1 = vsel %vm284_vm1, %v673_v22, 0 }
 0x20a   :  { %695 = vmatpush.bf16.msrb.mxu0 %v681_v1 }
 0x20b   :  { %v588_v49 = vpop.permute.xlu0 %587  ;;  %v1467_v48 = vpop.permute.xlu2 %551 }
 0x20c   :  { %v595_v51 = vsel %vm193_vm2, %v586_v15, %v588_v49  ;;  %v616_v14 = vpop.permute.xlu1 %615 }
 0x20d   :  { %v645_v3 = vmul.f32 %v595_v51, %v1128_v60  ;;  %v620_v42 = vsel %vm219_vm0, %v616_v14, %v610_v50  ;;  %v640_v50 = vmul.f32 %v1401_v2, %v1116_v53 }
 0x20e   :  { %v656_v0 = vmul.f32 %v620_v42, %v1063_v10 }
 0x20f   :  { %v669_v25 = vpack.c.bf16 %v649_v24, %v645_v3 }
 0x210   :  { %v676_v9 = vpack.c.bf16 %v656_v0, %v656_v0 }
 0x211   :  { %696 = vmatpush.bf16.msrb.mxu0 %v669_v25 }
 0x212   :  { %v690_v17 = vsel %vm284_vm1, %v676_v9, 0 }
 0x213   :  { %v1476_v33 = vpop.permute.xlu0 %527  ;;  %v1478_v13 = vpop.permute.xlu2 %563  ;;  %734 = vmatpush.bf16.msrb.mxu3 %v690_v17 }
 0x214   :  { %v592_v32 = vpop.permute.xlu1 %591 }
 0x215   :  { %v596_v47 = vsel %vm193_vm2, %v592_v32, %v586_v15 }
 0x216   :  { %v648_v34 = vmul.f32 %v596_v47, %v1086_v27 }
 0x21b   :  { %v1481_v56 = vpop.permute.xlu0 %539  ;;  %v576_v60 = vpop.permute.xlu2 %575 }
 0x21c   :  { %v583_v37 = vsel %vm180_vm4, %v574_v20, %v576_v60  ;;  %v604_v40 = vpop.permute.xlu1 %603 }
 0x21d   :  { %v641_v10 = vmul.f32 %v583_v37, %v1190_v59  ;;  %v608_v16 = vsel %vm206_vm3, %v604_v40, %v598_v11 }
 0x21e   :  { %v652_v12 = vmul.f32 %v608_v16, %v1090_v30 }
 0x21f   :  { %v665_v28 = vpack.c.bf16 %v641_v10, %v637_v39  ;;  %v1628_v39 = vld [vmem:[#allocation15_spill] sm:$0xff] }
 0x220   :  { %v672_v41 = vpack.c.bf16 %v652_v12, %v648_v34 }
 0x221   :  { %697 = vmatpush.bf16.msrb.mxu0 %v665_v28 }
 0x222   :  { %735 = vmatpush.bf16.msrb.mxu3 %v672_v41 }
 0x223   :  { %v614_v19 = vpop.permute.xlu0 %613  ;;  %v580_v44 = vpop.permute.xlu2 %579 }
 0x224   :  { %v617_v59 = vsel %vm219_vm0, %v614_v19, %v616_v14  ;;  %v618_v55 = vsel %vm219_vm0, %v612_v29, %v614_v19  ;;  %v584_v46 = vsel %vm180_vm4, %v580_v44, %v574_v20  ;;  %v578_v15 = vpop.permute.xlu1 %577  ;;  %vm1629_vm0 = vcmp.lt.s32.totalorder %v1060_v7, 17 }
 0x225   :  { %v654_v58 = vmul.f32 %v618_v55, %v1104_v43  ;;  %v655_v27 = vmul.f32 %v617_v59, %v1071_v18  ;;  %v644_v30 = vmul.f32 %v584_v46, %v1135_v5  ;;  %v582_v2 = vsel %vm180_vm4, %v576_v60, %v578_v15  ;;  %v1635_v55 = vld [vmem:[#allocation16_spill] sm:$0xff]  ;;  %vm1643_vm14 = vmmov %vm1629_vm0 }
 0x226   :  { %v581_v1 = vsel %vm180_vm4, %v578_v15, %v580_v44  ;;  %v642_v25 = vmul.f32 %v582_v2, %v1192_v62  ;;  %v1634_v44 = vld [vmem:[#allocation23_spill] sm:$0xff]  ;;  %vm1641_vm4 = vcmask 588800   ;;  %vm1644_vm15 = vmmov %vm1629_vm0 }
 0x227   :  { %v668_v11 = vpack.c.bf16 %v644_v30, %v640_v50  ;;  %v674_v6 = vpack.c.bf16 %v654_v58, %v654_v58  ;;  %v675_v21 = vpack.c.bf16 %v655_v27, %v655_v27  ;;  %v643_v17 = vmul.f32 %v581_v1, %v1133_v63  ;;  %v1636_v58 = vld [vmem:[#allocation22_spill] sm:$0xff]  ;;  %vm1651_vm13 = vmmov %vm1641_vm4 }
 0x228   :  { %vm1652_vm10 = vmmov %vm1641_vm4 }
 0x229   :  { %736 = vmatpush.bf16.msrb.mxu3 %v668_v11  ;;  %v684_v22 = vsel %vm284_vm1, %v674_v6, 0  ;;  %v687_v29 = vsel %vm284_vm1, %v675_v21, 0  ;;  %vm1630_vm1 = vmmov %vm1629_vm0  ;;  %v77_v21 = vld [vmem:[#allocation7] sm:$0xf] }
 0x22a   :  { %708 = vmatpush.bf16.msrb.mxu1 %v684_v22  ;;  %721 = vmatpush.bf16.msrb.mxu2 %v687_v29  ;;  %v1637_v29 = vld [vmem:[#allocation20_spill] sm:$0xff] }
 0x22b   :  { %v590_v20 = vpop.permute.xlu0 %589 }
 0x22c   :  { %v556_v43 = vpop.permute.xlu1 %555  ;;  %v593_v18 = vsel %vm193_vm2, %v590_v20, %v592_v32  ;;  %v594_v5 = vsel %vm193_vm2, %v588_v49, %v590_v20  ;;  %vm1631_vm2 = vcmp.lt.s32.totalorder %v1060_v7, 16  ;;  %v802_v7 = vld [vmem:[#allocation2 + $0x10] sm:$0xff] }
 0x22d   :  { %v646_v24 = vmul.f32 %v594_v5, %v1130_v61  ;;  %v647_v3 = vmul.f32 %v593_v18, %v1078_v23  ;;  %v639_v61 = vmul.f32 %v1419_v36, %v1114_v52  ;;  %v532_v23 = vpop.permute.xlu2 %531  ;;  %v1638_v18 = vld [vmem:[#allocation21_spill] sm:$0xff]  ;;  %vm1646_vm11 = vmmov %vm1631_vm2 }
 0x22f   :  { %v667_v60 = vpack.c.bf16 %v643_v17, %v639_v61  ;;  %v1648_v17 = vld [vmem:[#allocation27_spill] sm:$0xff] }
 0x233   :  { %v602_v53 = vpop.permute.xlu0 %601 }
 0x234   :  { %v605_v45 = vsel %vm206_vm3, %v602_v53, %v604_v40  ;;  %v606_v51 = vsel %vm206_vm3, %v600_v4, %v602_v53  ;;  %v568_v42 = vpop.permute.xlu1 %567  ;;  %v638_v4 = vmul.f32 %v1388_v8, %v1186_v57  ;;  %vm1632_vm3 = vmmov %vm1631_vm2 }
 0x235   :  { %v650_v14 = vmul.f32 %v606_v51, %v1118_v54  ;;  %v651_v49 = vmul.f32 %v605_v45, %v1084_v26  ;;  %v544_v8 = vpop.permute.xlu2 %543  ;;  %v1640_v51 = vld [vmem:[#allocation19_spill] sm:$0xff] }
 0x236   :  { %v666_v54 = vpack.c.bf16 %v642_v25, %v638_v4 }
 0x237   :  { %v670_v0 = vpack.c.bf16 %v650_v14, %v646_v24  ;;  %v671_v9 = vpack.c.bf16 %v651_v49, %v647_v3 }
 0x239   :  { %709 = vmatpush.bf16.msrb.mxu1 %v670_v0  ;;  %722 = vmatpush.bf16.msrb.mxu2 %v671_v9  ;;  %v1647_v0 = vld [vmem:[#allocation26_spill] sm:$0xff] }
 0x23b   :  { %v554_v32 = vpop.permute.xlu0 %553 }
 0x23c   :  { %v530_v26 = vpop.permute.xlu1 %529  ;;  %v557_v62 = vsel %vm154_vm5, %v554_v32, %v556_v43  ;;  %v558_v63 = vsel %vm154_vm5, %v1467_v48, %v554_v32  ;;  %v1650_v32 = vld [vmem:[#allocation25_spill] sm:$0xff] }
 0x23d   :  { %710 = vmatpush.bf16.msrb.mxu1 %v666_v54  ;;  %723 = vmatpush.bf16.msrb.mxu2 %v667_v60  ;;  %v631_v36 = vmul.f32 %v558_v63, %v1169_v35  ;;  %v632_v47 = vmul.f32 %v557_v62, %v1162_v31  ;;  %v533_v16 = vsel %vm1629_vm0, %v530_v26, %v532_v23  ;;  %v526_v53 = vpop.permute.xlu2 %525  ;;  %v803_v63 = vld [vmem:[#allocation2 + $0x18] sm:$0xff] }
 0x23e   :  { %v534_v28 = vsel %vm1630_vm1, %v1476_v33, %v530_v26  ;;  %v624_v27 = vmul.f32 %v533_v16, %v1636_v58  ;;  %v535_v24 = vsel %vm1643_vm14, %v526_v53, %v1476_v33  ;;  %v536_v3 = vsel %vm1644_vm15, %v532_v23, %v526_v53  ;;  %v1649_v33 = vld [vmem:[#allocation24_spill] sm:$0xff] }
 0x23f   :  { %v623_v46 = vmul.f32 %v534_v28, %v1635_v55  ;;  %v621_v9 = vmul.f32 %v536_v3, %v1647_v0  ;;  %v622_v4 = vmul.f32 %v535_v24, %v1648_v17 }
 0x243   :  { %v566_v37 = vpop.permute.xlu0 %565 }
 0x244   :  { %v569_v57 = vsel %vm167_vm6, %v566_v37, %v568_v42  ;;  %v570_v52 = vsel %vm167_vm6, %v1478_v13, %v566_v37  ;;  %v542_v34 = vpop.permute.xlu1 %541 }
 0x245   :  { %v635_v10 = vmul.f32 %v570_v52, %v1174_v38  ;;  %v636_v40 = vmul.f32 %v569_v57, %v1628_v39  ;;  %v545_v12 = vsel %vm1631_vm2, %v542_v34, %v544_v8  ;;  %v546_v35 = vsel %vm1632_vm3, %v1481_v56, %v542_v34  ;;  %v1633_v38 = vld [vmem:[#allocation17_spill] sm:$0xff] }
 0x246   :  { %v627_v19 = vmul.f32 %v546_v35, %v1633_v38  ;;  %v628_v59 = vmul.f32 %v545_v12, %v1634_v44 }
 0x247   :  { %v663_v31 = vpack.c.bf16 %v635_v10, %v631_v36  ;;  %v664_v41 = vpack.c.bf16 %v636_v40, %v632_v47  ;;  %v805_v47 = vld [vmem:[#allocation2 + $0x8] sm:$0xff] }
 0x248   :  { %v659_v50 = vpack.c.bf16 %v627_v19, %v623_v46  ;;  %v660_v15 = vpack.c.bf16 %v628_v59, %v624_v27 }
 0x249   :  { %724 = vmatpush.bf16.msrb.mxu2 %v663_v31  ;;  %737 = vmatpush.bf16.msrb.mxu3 %v664_v41 }
 0x24b   :  { %v550_v30 = vpop.permute.xlu0 %549 }
 0x24c   :  { %v559_v11 = vsel %vm154_vm5, %v550_v30, %v1467_v48  ;;  %v560_v6 = vsel %vm154_vm5, %v556_v43, %v550_v30  ;;  %v562_v22 = vpop.permute.xlu1 %561  ;;  %v1639_v48 = vld [vmem:[#allocation18_spill] sm:$0xff]  ;;  %vm1642_vm5 = vmmov %vm1641_vm4 }
 0x24d   :  { %725 = vmatpush.bf16.msrb.mxu2 %v659_v50  ;;  %738 = vmatpush.bf16.msrb.mxu3 %v660_v15  ;;  %v629_v20 = vmul.f32 %v560_v6, %v1637_v29  ;;  %v630_v5 = vmul.f32 %v559_v11, %v1638_v18  ;;  %v571_v2 = vsel %vm167_vm6, %v562_v22, %v1478_v13 }
 0x24e   :  { %v572_v1 = vsel %vm167_vm6, %v568_v42, %v562_v22  ;;  %v634_v43 = vmul.f32 %v571_v2, %v1640_v51  ;;  %vm1645_vm6 = vmmov %vm1631_vm2 }
 0x24f   :  { %v633_v45 = vmul.f32 %v572_v1, %v1639_v48 }
 0x250   :  { %777 = vmatmul.msk.bf16.vlgmr.msrb.gmra.mxu2 %vm1641_vm4, %v77_v21  ;;  %778 = vmatmul.msk.bf16.vlgmr.msrb.gmra.mxu3 %vm1642_vm5, %v77_v21  ;;  %v662_v13 = vpack.c.bf16 %v634_v43, %v630_v5 }
 0x251   :  { %v661_v14 = vpack.c.bf16 %v633_v45, %v629_v20 }
 0x252   :  { %711 = vmatpush.bf16.msrb.mxu1 %v662_v13 }
 0x253   :  { %v538_v49 = vpop.permute.xlu0 %537  ;;  %698 = vmatpush.bf16.msrb.mxu0 %v661_v14 }
 0x254   :  { %v547_v42 = vsel %vm1645_vm6, %v538_v49, %v1481_v56  ;;  %v548_v25 = vsel %vm1646_vm11, %v544_v8, %v538_v49  ;;  %v804_v8 = vld [vmem:[#allocation2] sm:$0xff] }
 0x255   :  { %v625_v61 = vmul.f32 %v548_v25, %v1649_v33  ;;  %v626_v23 = vmul.f32 %v547_v42, %v1650_v32 }
 0x257   :  { %v657_v54 = vpack.c.bf16 %v625_v61, %v621_v9  ;;  %v658_v60 = vpack.c.bf16 %v626_v23, %v622_v4 }
 0x259   :  { %699 = vmatpush.bf16.msrb.mxu0 %v657_v54  ;;  %712 = vmatpush.bf16.msrb.mxu1 %v658_v60 }
 0x25c   :  { %775 = vmatmul.msk.bf16.vlgmr.msrb.gmra.mxu0 %vm1651_vm13, %v77_v21  ;;  %776 = vmatmul.msk.bf16.vlgmr.msrb.gmra.mxu1 %vm1652_vm10, %v77_v21 }
 0x2d3   :  { %v727_v56 = vpop.f32.mrf.mxu2  ;;  %v740_v26 = vpop.f32.mrf.mxu3 }
 0x2d4   :  { %v728_v62 = vadd.f32 %v802_v7, %v727_v56  ;;  %v741_v37 = vadd.f32 %v803_v63, %v740_v26 }
 0x2d6   :  { %746 = vst [vmem:[#allocation10 + $0x10] sm:$0xff] %v728_v62 }
 0x2d7   :  { %747 = vst [vmem:[#allocation10 + $0x18] sm:$0xff] %v741_v37 }
 0x2d9   :  { %v701_v57 = vpop.f32.mrf.mxu0  ;;  %v714_v52 = vpop.f32.mrf.mxu1 }
 0x2da   :  { %v702_v36 = vadd.f32 %v804_v8, %v701_v57  ;;  %v715_v10 = vadd.f32 %v805_v47, %v714_v52 }
 0x2db   :  { %v729_v39 = vpop.f32.mrf.mxu2  ;;  %v742_v40 = vpop.f32.mrf.mxu3 }
 0x2dc   :  { %744 = vst [vmem:[#allocation10] sm:$0xff] %v702_v36 }
 0x2dd   :  { %745 = vst [vmem:[#allocation10 + $0x8] sm:$0xff] %v715_v10 }
 0x2de   :  { %758 = dma.vmem_to_hbm [thread:$0]  %s754_s16, 512, %s756_s19, [#allocation4]  }
 0x2e1   :  { %v703_v16 = vpop.f32.mrf.mxu0  ;;  %v716_v28 = vpop.f32.mrf.mxu1 }
 0x2e2   :  { %932 = dma.done.wait [#allocation4], 512  }
 0x2e3   :  { %933 = vsyncadd [#allocation4], 4294966784 }
 0x2e4   :  { %763 = vsyncpa [#allocation3], 1 }
 0x2e5   :  { %764 = vsyncpa [#allocation6], 1 }
 0x2e6   :  { %765 = vsyncpa [#allocation9], 1 }
 0x2e7   :  { %766 = vsyncpa [#allocation4], 1 }

</bundles_post_ra>
